<compile_context>
chip_gen: v6e
topology: v6e:2x2x1
jax: 0.10.0
libtpu: 0.0.40
codegen_flags: <defaults>
</compile_context>

<pallas_src>
import jax
import jax.numpy as jnp
from jax import lax
from jax.experimental import pallas as pl
from jax.experimental.pallas import tpu as pltpu


def _fused_fc_kernel(x_ref, w_ref, b_ref, o_ref):
    # x_ref: (TM, C)   activation tile (streamed over the grid)
    # w_ref: (C, C)    folded weight (Wv + Wh + Wd)^T, laid out (C_in, C_out)
    # b_ref: (1, C)    bias
    # o_ref: (TM, C)   output tile
    acc = jnp.dot(x_ref[...], w_ref[...], preferred_element_type=jnp.float32)
    acc = acc + b_ref[...].astype(jnp.float32)
    o_ref[...] = acc.astype(o_ref.dtype)


def rnn3d_base_forward(x, fc_weight, fc_bias, *, block_m: int = 512):
    """Pallas forward for RNN3DBase (identity RNNs, union='cat', with_fc=True).

    x:         (B, H, W, D, C)
    fc_weight: (C, 3*C)  -- nn.Linear(3*output_size, input_size).weight layout,
                            valid when output_size == C (e.g. hidden=C//2, bidir)
    fc_bias:   (C,)
    returns    (B, H, W, D, C)
    """
    B, H, W, D, C = x.shape
    out_c, in_c = fc_weight.shape
    if in_c != 3 * C or out_c != C:
        raise ValueError("fc weight must have shape (C, 3*C) for the identity-RNN forward")

    # Flatten all spatial/batch dims into one lane-dense 2D problem (M, C).
    M = B * H * W * D
    x2 = x.reshape(M, C)

    # Fold the three weight blocks: cat([x, x, x]) @ W^T == x @ (Wv+Wh+Wd)^T.
    # (C_out, 3, C_in) --sum--> (C_out, C_in) --T--> (C_in, C_out).
    w_folded = jnp.transpose(fc_weight.reshape(C, 3, C).sum(axis=1), (1, 0))
    w_folded = w_folded.astype(x.dtype)
    b2 = fc_bias.reshape(1, C)

    # Tile the fused row axis.  Keep the tile sublane-aligned (multiple of 8)
    # and pad M up to a whole number of tiles (padded rows sliced off below).
    def _round_up(v, m):
        return ((v + m - 1) // m) * m

    tm = min(block_m, _round_up(max(M, 1), 8))
    m_pad = _round_up(M, tm)
    if m_pad != M:
        x2 = jnp.pad(x2, ((0, m_pad - M), (0, 0)))

    grid = (m_pad // tm,)

    out = pl.pallas_call(
        _fused_fc_kernel,
        out_shape=jax.ShapeDtypeStruct((m_pad, C), x.dtype),
        grid=grid,
        in_specs=[
            pl.BlockSpec((tm, C), lambda i: (i, 0)),  # activation tile (streamed)
            pl.BlockSpec((C, C), lambda i: (0, 0)),   # folded weight: VMEM-resident
            pl.BlockSpec((1, C), lambda i: (0, 0)),   # bias:          VMEM-resident
        ],
        out_specs=pl.BlockSpec((tm, C), lambda i: (i, 0)),
        compiler_params=pltpu.CompilerParams(
            dimension_semantics=("parallel",),
        ),
    )(x2, w_folded, b2)

    if m_pad != M:
        out = out[:M]
    return out.reshape(B, H, W, D, C)


if __name__ == "__main__":
    key = jax.random.PRNGKey(0)
    k_x, k_w, k_b = jax.random.split(key, 3)

    # Small RNN3DBase-consistent shapes: input_size=C=128 (hidden_size=64,
    # bidirectional -> output_size=128 so the cat+fc path type-checks),
    # 8x8x8 volume, batch 2.
    B, H, W, D, C = 2, 8, 8, 8, 128
    x = jax.random.normal(k_x, (B, H, W, D, C), dtype=jnp.float32)
    fc_weight = jax.random.normal(k_w, (C, 3 * C), dtype=jnp.float32) / jnp.sqrt(3.0 * C)
    fc_bias = jax.random.normal(k_b, (C,), dtype=jnp.float32)

    y = jax.block_until_ready(rnn3d_base_forward(x, fc_weight, fc_bias))

    # Pure-JAX reference of the PyTorch forward (identity RNNs + cat + fc).
    cat = jnp.concatenate([x, x, x], axis=-1)
    y_ref = (
        jnp.einsum("bhwdk,ck->bhwdc", cat, fc_weight,
                   precision=lax.Precision.HIGHEST)
        + fc_bias
    )

    assert y.shape == (B, H, W, D, C) and y.dtype == x.dtype
    assert jnp.allclose(y, y_ref, atol=2e-2, rtol=2e-2)
    print("KERNEL_OK")
</pallas_src>

<mosaic_0001>
module attributes {stable_mosaic.version = 11 : i64} {
  func.func @_fused_fc_kernel(%arg0: i32, %arg1: memref<512x128xf32, #tpu.memory_space<vmem>>, %arg2: memref<128x128xf32, #tpu.memory_space<vmem>>, %arg3: memref<1x128xf32, #tpu.memory_space<vmem>>, %arg4: memref<512x128xf32, #tpu.memory_space<vmem>>) attributes {dimension_semantics = [#tpu.dimension_semantics<parallel>], iteration_bounds = array<i64: 2>, scalar_prefetch = 0 : i64, scratch_operands = 0 : i64, tpu.core_type = #tpu.core_type<tc>, window_params = [{transform_indices = @transform_0, window_bounds = array<i64: 512, 128>}, {pipeline_mode = #tpu.pipeline_mode<synchronous>, transform_indices = @transform_1, window_bounds = array<i64: 128, 128>}, {pipeline_mode = #tpu.pipeline_mode<synchronous>, transform_indices = @transform_2, window_bounds = array<i64: 1, 128>}, {transform_indices = @transform_3, window_bounds = array<i64: 512, 128>}]} {
    %c0 = arith.constant 0 : index
    %c0_0 = arith.constant 0 : index
    %0 = vector.load %arg1[%c0, %c0_0] : memref<512x128xf32, #tpu.memory_space<vmem>>, vector<512x128xf32>
    %c0_1 = arith.constant 0 : index
    %c0_2 = arith.constant 0 : index
    %1 = vector.load %arg2[%c0_1, %c0_2] : memref<128x128xf32, #tpu.memory_space<vmem>>, vector<128x128xf32>
    %cst = arith.constant dense<0.000000e+00> : vector<512x128xf32>
    %2 = tpu.matmul %0, %1, %cst {dimension_numbers = #tpu.dot_dimension_numbers<[1], [0], [0], [1], [0, 0, 1, 1], [], []>} : vector<512x128xf32>, vector<128x128xf32>, vector<512x128xf32> -> vector<512x128xf32>
    %c0_3 = arith.constant 0 : index
    %c0_4 = arith.constant 0 : index
    %3 = vector.load %arg3[%c0_3, %c0_4] : memref<1x128xf32, #tpu.memory_space<vmem>>, vector<1x128xf32>
    %4 = vector.broadcast %3 : vector<1x128xf32> to vector<512x128xf32>
    %5 = arith.addf %2, %4 : vector<512x128xf32>
    %c0_5 = arith.constant 0 : index
    %c0_6 = arith.constant 0 : index
    %6 = vector.load %arg4[%c0_5, %c0_6] : memref<512x128xf32, #tpu.memory_space<vmem>>, vector<512x128xf32>
    tpu.vector_store %arg4[%c0_5, %c0_6], %5 {strides = array<i32>} : memref<512x128xf32, #tpu.memory_space<vmem>>, vector<512x128xf32>,
    return
  }
  func.func @transform_0(%arg0: i32) -> (i32, i32) {
    %c0_i32 = arith.constant 0 : i32
    %c0_i32_0 = arith.constant 0 : i32
    return %arg0, %c0_i32 : i32, i32
  }
  func.func @transform_1(%arg0: i32) -> (i32, i32) {
    %c0_i32 = arith.constant 0 : i32
    %c0_i32_0 = arith.constant 0 : i32
    %c0_i32_1 = arith.constant 0 : i32
    return %c0_i32, %c0_i32_0 : i32, i32
  }
  func.func @transform_2(%arg0: i32) -> (i32, i32) {
    %c0_i32 = arith.constant 0 : i32
    %c0_i32_0 = arith.constant 0 : i32
    %c0_i32_1 = arith.constant 0 : i32
    return %c0_i32, %c0_i32_0 : i32, i32
  }
  func.func @transform_3(%arg0: i32) -> (i32, i32) {
    %c0_i32 = arith.constant 0 : i32
    %c0_i32_0 = arith.constant 0 : i32
    return %arg0, %c0_i32 : i32, i32
  }
}

</mosaic_0001>

<bundles_post_ra>
// kernel: tpu_custom_call.1
= control target key start
LH: loop header
LB: loop body
LE: loop exit
PB: predicated region body
PF: predicated region fallthrough
CT: control target
= control target key end

     0   :  { %8 = vsyncpa [#allocation3], 0  ;;  %s1699_s0 = inlined_call_operand.hbm [shape: f32[1024,128], index: 0, kind: input, shape index: {}]   ;;  %s1700_s1 = inlined_call_operand.hbm [shape: f32[128,128], index: 1, kind: input, shape index: {}]   ;;  %s1701_s2 = inlined_call_operand.vmem [shape: f32[1,128], index: 2, kind: input, shape index: {}]   ;;  %s1702_s3 = inlined_call_operand.hbm [shape: f32[1024,128], index: 3, kind: output, shape index: {}]  }
   0x1   :  { %10 = vsyncpa [#allocation3 + $0x1], 0 }
   0x2   :  { %11 = vsyncpa [#allocation6], 0 }
   0x3   :  { %12 = vsyncpa [#allocation4], 0 }
   0x4   :  { %14 = vsyncpa [#allocation4 + $0x1], 0  ;;  %s1310_s12 = smov 0   ;;  %s1312_s13 = smov 0  }
   0x5   :  { %s1314_s14 = smov 0   ;;  %s1316_s15 = smov 0  }
   0x6 LB: > { %s1331_s16 = sadd.s32 4294967295, %s1281_s15   ;;  %s839_s17 = sadd.s32 4294967294, %s1281_s15   ;;  %s1281_s15 = sphi %s1316_s15, %s1724_s15   ;;  %s1277_s14 = sphi %s1314_s14, %s1723_s14   ;;  %s1273_s13 = sphi %s1312_s13, %s1722_s13   ;;  %s1269_s12 = sphi %s1310_s12, %s1721_s12  }
   0x7   : > { %p40_p0 = scmp.ne.s32.totalorder %s1273_s13, %s1269_s12  ;;  %p1703_p1 = scmp.eq.s32.totalorder %s1331_s16, 0 }
   0x8   : > { %p112_p3 = scmp.eq.s32.totalorder %s839_s17, 1  ;;  %p840_p5 = scmp.ge.s32.totalorder %s1281_s15, 1 }
   0x9   : > { %p1340_p4 = por %p1703_p1, %p40_p0  ;;  %p119_p7 = scmp.lt.s32.totalorder %s1281_s15, 3 }
   0xa   : > { %p1345_p6 = por %p112_p3, %p40_p0  ;;  %s1283_s21 = smov [#allocation5]  }
   0xb   : > { %s1707_s18 = scalar_select %p1340_p4, 1, 0 }
   0xc   : > { %s1708_s19 = scalar_select %p1345_p6, 1, 0 }
   0xd   : > { %p1350_p8 = pnand %p840_p5, %p119_p7  ;;  %s131_s22 = sshll.u32 %s1283_s21, 4  ;;  %s132_s22 = int_to_ptr.vmem [resolvable:$true] %s131_s22 }
   0xe   : > { %s1364_s24 = sadd.s32 1, %s1281_s15   ;;  %s27_s25 = sadd.s32 1, %s1277_s14 }
   0xf   : > { %s1709_s20 = scalar_select %p1350_p8, 1, 0 }
  0x10   : > { %p1106_p9 = pneg %p1350_p8  ;;  %s24_s26 = ssub.s32 %s1281_s15, %s1364_s24 }
  0x11   : > { %s1170_s27 = scalar_lea.vmem %s132_s22, 2048  ;;  %p1178_p5 = scmp.lt.s32.totalorder %s132_s22, %s132_s22 }
  0x12   : > { %p1359_p11 = pnand %p1106_p9, %p1703_p1  ;;  %p1171_p13 = scmp.ne.s32.totalorder %s132_s22, %s1170_s27 }
  0x13   : > { %p1179_p7 = scmp.lt.s32.totalorder %s1170_s27, %s1170_s27 }
  0x14   : > { %p1161_p12 = pneg %p1359_p11 }
  0x15   : > { %p1180_p10 = por %p1179_p7, %p1178_p5 }
  0x16   : > { %p1173_p0 = pnand %p1171_p13, %p1161_p12 }
  0x18   : > { %p1174_p3 = pneg %p1173_p0 }
  0x1a   : > { %p1181_p2 = pnand %p1180_p10, %p1174_p3 }
  0x1c   : > { %1184 = shalt.err (!%p1181_p2)
}
  0x1d   : > { %s1284_s28 = smov 128   ;;  %s1285_s29 = smov 8  }
  0x1e   : > { %1109 = dma.hbm_to_vmem [thread:$0]  (!%p1359_p11), %s1700_s1, 2048, %s132_s22, [#allocation6], %s1284_s28, %s1284_s28, %s1285_s29  }
  0x1f   : > { %p25_p2 = scmp.eq.s32.totalorder %s24_s26, 0  ;;  %p34_p9 = scmp.ne.s32.totalorder %s1277_s14, %s1273_s13 }
  0x20   : > { %p35_p10 = scmp.eq.s32.totalorder %s1281_s15, 0  ;;  %p1119_p12 = scmp.lt.s32.totalorder %s1281_s15, 2 }
  0x21   : > { %s1384_s5 = scalar_select %p25_p2, %s1277_s14, %s27_s25  }
  0x22   : > { %p36_p13 = por %p35_p10, %p34_p9  ;;  %p1711_p0 = scmp.eq.s32.totalorder %s1331_s16, 1 }
  0x23   : > { %s148_s7 = sand.u32 1, %s1277_s14   ;;  %s856_s8 = sshll.u32 %s1281_s15, 13 }
  0x24   : > { %p1388_p3 = por %p1711_p0, %p34_p9  ;;  %s843_s9 = sshll.u32 %s148_s7, 9 }
  0x25   : > { %s1397_s17 = scalar_lea.hbm %s1699_s0, %s856_s8  ;;  %s152_s21 = scalar_lea.vmem [#allocation2], %s843_s9 }
  0x26   : > { %s1712_s6 = scalar_select %p1388_p3, 1, 0 }
  0x27   : > { %s159_s22 = sshll.u32 %s152_s21, 4  ;;  %p1399_p11 = pnand %p1119_p12, %p36_p13  ;;  %s1403_s22 = int_to_ptr.vmem [resolvable:$true] %s159_s22 }
  0x28   : > { %s1405_s25 = scalar_lea.sflag [#allocation3], %s148_s7  ;;  %s1185_s26 = scalar_lea.hbm %s1397_s17, 8192 }
  0x29   : > { %p1186_p5 = scmp.ne.s32.totalorder %s1397_s17, %s1185_s26  ;;  %p1187_p7 = pneg %p1399_p11 }
  0x2a   : > { %s1190_s4 = scalar_lea.hbm %s1699_s0, 16384  ;;  %p1191_p10 = scmp.lt.s32.totalorder %s1397_s17, %s1699_s0 }
  0x2b   : > { %p1188_p2 = pnand %p1187_p7, %p1186_p5  ;;  %p1192_p12 = scmp.lt.s32.totalorder %s1190_s4, %s1185_s26 }
  0x2d   : > { %p1189_p9 = pneg %p1188_p2  ;;  %p1193_p13 = por %p1192_p12, %p1191_p10 }
  0x2f   : > { %p1194_p0 = pnand %p1193_p13, %p1189_p9 }
  0x31   : > { %1197 = shalt.err (!%p1194_p0)
}
  0x32   : > { %s1198_s7 = scalar_lea.vmem %s1403_s22, 8192  ;;  %s1286_s10 = smov [#allocation2]  }
  0x33   : > { %p1199_p1 = scmp.ne.s32.totalorder %s1403_s22, %s1198_s7  ;;  %s1203_s11 = sshll.u32 %s1286_s10, 4  ;;  %s1204_s11 = int_to_ptr.vmem [resolvable:$false] %s1203_s11 }
  0x34   : > { %s1205_s21 = scalar_lea.vmem %s1204_s11, 16384  ;;  %p1206_p2 = scmp.lt.s32.totalorder %s1403_s22, %s1204_s11 }
  0x35   : > { %p1201_p6 = pnand %p1199_p1, %p1187_p7  ;;  %p1207_p3 = scmp.lt.s32.totalorder %s1205_s21, %s1198_s7 }
  0x37   : > { %p1202_p5 = pneg %p1201_p6  ;;  %p1208_p4 = por %p1207_p3, %p1206_p2 }
  0x39   : > { %p1209_p8 = pnand %p1208_p4, %p1202_p5 }
  0x3b   : > { %1212 = shalt.err (!%p1209_p8)
}
  0x3c   : > { %1113 = dma.hbm_to_vmem [thread:$0]  (!%p1399_p11), %s1397_s17, 8192, %s1403_s22, %s1405_s25, %s1284_s28, %s1284_s28, %s1285_s29  }
  0x3d   : > { %p1714_p1 = scmp.ne.s32.totalorder %s1709_s20, 0 }
  0x3e   : > { %s1432_s26 = sand.u32 (!%p1714_p1), 1, %s1273_s13   ;;  %p1715_p4 = scmp.ne.s32.totalorder (!%p1714_p1), %s1707_s18, 0 }
  0x3f   : > { %171 = sbr.rel (%p1714_p1) target bundleno = 377 (0x179), region = 32  ;;  %s847_s27 = sshll.u32 (!%p1714_p1), %s1432_s26, 9 }
  0x40   : > { %s174_s30 = scalar_lea.sflag (!%p1714_p1), [#allocation3], %s1432_s26  ;;  %s1438_s23 = scalar_lea.vmem (!%p1714_p1), [#allocation2], %s847_s27 }
  0x44   : > { %1256 = dma.done.wait (%p1715_p4), %s174_s30, 8192  }
  0x45   : > { %1258 = vsyncadd (%p1715_p4), %s174_s30, 4294959104  ;;  %p1716_p6 = scmp.eq.s32.totalorder %s1331_s16, 0 }
  0x47   : > { %1260 = dma.done.wait (%p1716_p6), [#allocation6], 2048   ;;  %p1717_p8 = pmov %p1716_p6 }
  0x48   : > { %v285_v0 = vld [vmem:[#allocation5 + $0x78] sm:$0xff]  ;;  %v284_v1 = vld [vmem:[#allocation5 + $0x70] sm:$0xff]  ;;  %v283_v2 = vld [vmem:[#allocation5 + $0x68] sm:$0xff]  ;;  %s1521_s28 = scalar_lea.vmem [#allocation7], %s847_s27  ;;  %s857_s29 = sshll.u32 %s1331_s16, 13 }
  0x49   : > { %1262 = vsyncadd (%p1717_p8), [#allocation6], 4294965248  ;;  %938 = vmatprep.subr.mxu0 %v285_v0  ;;  %1066 = vmatprep.subr.mxu1 %v285_v0  ;;  %v282_v3 = vld [vmem:[#allocation5 + $0x60] sm:$0xff]  ;;  %v281_v4 = vld [vmem:[#allocation5 + $0x58] sm:$0xff]  ;;  %s756_s17 = sshll.u32 %s1521_s28, 4  ;;  %s1648_s4 = scalar_lea.hbm %s1702_s3, %s857_s29  ;;  %s1650_s17 = int_to_ptr.vmem [resolvable:$true] %s756_s17 }
  0x4a   : > { %939 = vmatpush3.msra.mxu0 %v285_v0  ;;  %1082 = vmatpush3.msra.mxu1 %v285_v0  ;;  %v280_v5 = vld [vmem:[#allocation5 + $0x50] sm:$0xff]  ;;  %v279_v6 = vld [vmem:[#allocation5 + $0x48] sm:$0xff]  ;;  %v278_v7 = vld [vmem:[#allocation5 + $0x40] sm:$0xff]  ;;  %s743_s16 = scalar_lea.sflag [#allocation4], %s1432_s26  ;;  %s1213_s8 = scalar_lea.vmem %s1650_s17, 8192 }
  0x4b   : > { %940 = vmatprep.subr.mxu0 %v284_v1  ;;  %1067 = vmatprep.subr.mxu1 %v284_v1  ;;  %v277_v8 = vld [vmem:[#allocation5 + $0x38] sm:$0xff]  ;;  %v276_v9 = vld [vmem:[#allocation5 + $0x30] sm:$0xff]  ;;  %v275_v10 = vld [vmem:[#allocation5 + $0x28] sm:$0xff]  ;;  %p1214_p3 = scmp.ne.s32.totalorder %s1650_s17, %s1213_s8  ;;  %p1718_p11 = scmp.ne.s32.totalorder %s1712_s6, 0 }
  0x4c   : > { %941 = vmatpush3.msra.mxu0 %v284_v1  ;;  %1083 = vmatpush3.msra.mxu1 %v284_v1  ;;  %v274_v11 = vld [vmem:[#allocation5 + $0x20] sm:$0xff]  ;;  %v273_v12 = vld [vmem:[#allocation5 + $0x18] sm:$0xff]  ;;  %v272_v13 = vld [vmem:[#allocation5 + $0x10] sm:$0xff]  ;;  %s1287_s9 = smov [#allocation7]  }
  0x4d   : > { %942 = vmatprep.subr.mxu0 %v283_v2  ;;  %1068 = vmatprep.subr.mxu1 %v283_v2  ;;  %v271_v14 = vld [vmem:[#allocation5 + $0x8] sm:$0xff]  ;;  %v270_v15 = vld [vmem:[#allocation5] sm:$0xff]  ;;  %v208_v20 = vld [vmem:[%s1438_s23 + $0x10] sm:$0xff]  ;;  %p1215_p7 = pnand %p1214_p3, %p1718_p11  ;;  %s1217_s7 = sshll.u32 %s1287_s9, 4  ;;  %s1218_s7 = int_to_ptr.vmem [resolvable:$false] %s1217_s7 }
  0x4e   : > { %943 = vmatpush3.msra.mxu0 %v283_v2  ;;  %1084 = vmatpush3.msra.mxu1 %v283_v2  ;;  %v206_v16 = vld [vmem:[%s1438_s23] sm:$0xff]  ;;  %v207_v18 = vld [vmem:[%s1438_s23 + $0x8] sm:$0xff]  ;;  %v240_v21 = vld [vmem:[%s1438_s23 + $0x110] sm:$0xff]  ;;  %s1219_s10 = scalar_lea.vmem %s1218_s7, 16384  ;;  %p1220_p10 = scmp.lt.s32.totalorder %s1650_s17, %s1218_s7 }
  0x4f   : > { %944 = vmatprep.subr.mxu0 %v282_v3  ;;  %1069 = vmatprep.subr.mxu1 %v282_v3  ;;  %v238_v17 = vld [vmem:[%s1438_s23 + $0x100] sm:$0xff]  ;;  %v239_v19 = vld [vmem:[%s1438_s23 + $0x108] sm:$0xff]  ;;  %v209_v22 = vld [vmem:[%s1438_s23 + $0x18] sm:$0xff]  ;;  %p1216_p9 = pneg %p1215_p7  ;;  %p1221_p12 = scmp.lt.s32.totalorder %s1219_s10, %s1213_s8 }
  0x50   : > { %945 = vmatpush3.msra.mxu0 %v282_v3  ;;  %1085 = vmatpush3.msra.mxu1 %v282_v3  ;;  %v241_v23 = vld [vmem:[%s1438_s23 + $0x118] sm:$0xff]  ;;  %v210_v24 = vld [vmem:[%s1438_s23 + $0x20] sm:$0xff]  ;;  %v211_v26 = vld [vmem:[%s1438_s23 + $0x28] sm:$0xff] }
  0x51   : > { %946 = vmatprep.subr.mxu0 %v281_v4  ;;  %1070 = vmatprep.subr.mxu1 %v281_v4  ;;  %v242_v25 = vld [vmem:[%s1438_s23 + $0x120] sm:$0xff]  ;;  %v243_v27 = vld [vmem:[%s1438_s23 + $0x128] sm:$0xff]  ;;  %v212_v28 = vld [vmem:[%s1438_s23 + $0x30] sm:$0xff]  ;;  %p1222_p13 = por %p1221_p12, %p1220_p10 }
  0x52   : > { %947 = vmatpush3.msra.mxu0 %v281_v4  ;;  %1086 = vmatpush3.msra.mxu1 %v281_v4  ;;  %v244_v29 = vld [vmem:[%s1438_s23 + $0x130] sm:$0xff]  ;;  %v213_v30 = vld [vmem:[%s1438_s23 + $0x38] sm:$0xff]  ;;  %v214_v32 = vld [vmem:[%s1438_s23 + $0x40] sm:$0xff] }
  0x53   : > { %948 = vmatprep.subr.mxu0 %v280_v5  ;;  %1071 = vmatprep.subr.mxu1 %v280_v5  ;;  %v245_v31 = vld [vmem:[%s1438_s23 + $0x138] sm:$0xff]  ;;  %v246_v33 = vld [vmem:[%s1438_s23 + $0x140] sm:$0xff]  ;;  %v215_v34 = vld [vmem:[%s1438_s23 + $0x48] sm:$0xff]  ;;  %p1223_p0 = pnand %p1222_p13, %p1216_p9 }
  0x54   : > { %949 = vmatpush3.msra.mxu0 %v280_v5  ;;  %1087 = vmatpush3.msra.mxu1 %v280_v5  ;;  %v247_v35 = vld [vmem:[%s1438_s23 + $0x148] sm:$0xff]  ;;  %v216_v36 = vld [vmem:[%s1438_s23 + $0x50] sm:$0xff]  ;;  %v217_v38 = vld [vmem:[%s1438_s23 + $0x58] sm:$0xff] }
  0x55   : > { %950 = vmatprep.subr.mxu0 %v279_v6  ;;  %1072 = vmatprep.subr.mxu1 %v279_v6  ;;  %v248_v37 = vld [vmem:[%s1438_s23 + $0x150] sm:$0xff]  ;;  %v249_v39 = vld [vmem:[%s1438_s23 + $0x158] sm:$0xff]  ;;  %v218_v40 = vld [vmem:[%s1438_s23 + $0x60] sm:$0xff] }
  0x56   : > { %951 = vmatpush3.msra.mxu0 %v279_v6  ;;  %1088 = vmatpush3.msra.mxu1 %v279_v6  ;;  %v250_v41 = vld [vmem:[%s1438_s23 + $0x160] sm:$0xff]  ;;  %v219_v42 = vld [vmem:[%s1438_s23 + $0x68] sm:$0xff]  ;;  %v220_v44 = vld [vmem:[%s1438_s23 + $0x70] sm:$0xff] }
  0x57   : > { %952 = vmatprep.subr.mxu0 %v278_v7  ;;  %1073 = vmatprep.subr.mxu1 %v278_v7  ;;  %v251_v43 = vld [vmem:[%s1438_s23 + $0x168] sm:$0xff]  ;;  %v252_v45 = vld [vmem:[%s1438_s23 + $0x170] sm:$0xff]  ;;  %v221_v46 = vld [vmem:[%s1438_s23 + $0x78] sm:$0xff] }
  0x58   : > { %953 = vmatpush3.msra.mxu0 %v278_v7  ;;  %1089 = vmatpush3.msra.mxu1 %v278_v7  ;;  %v253_v47 = vld [vmem:[%s1438_s23 + $0x178] sm:$0xff]  ;;  %v222_v48 = vld [vmem:[%s1438_s23 + $0x80] sm:$0xff]  ;;  %v223_v50 = vld [vmem:[%s1438_s23 + $0x88] sm:$0xff] }
  0x59   : > { %954 = vmatprep.subr.mxu0 %v277_v8  ;;  %1074 = vmatprep.subr.mxu1 %v277_v8  ;;  %v254_v49 = vld [vmem:[%s1438_s23 + $0x180] sm:$0xff]  ;;  %v255_v51 = vld [vmem:[%s1438_s23 + $0x188] sm:$0xff]  ;;  %v224_v52 = vld [vmem:[%s1438_s23 + $0x90] sm:$0xff] }
  0x5a   : > { %955 = vmatpush3.msra.mxu0 %v277_v8  ;;  %1090 = vmatpush3.msra.mxu1 %v277_v8  ;;  %v256_v53 = vld [vmem:[%s1438_s23 + $0x190] sm:$0xff]  ;;  %v225_v54 = vld [vmem:[%s1438_s23 + $0x98] sm:$0xff]  ;;  %v226_v56 = vld [vmem:[%s1438_s23 + $0xa0] sm:$0xff] }
  0x5b   : > { %956 = vmatprep.subr.mxu0 %v276_v9  ;;  %1075 = vmatprep.subr.mxu1 %v276_v9  ;;  %v257_v55 = vld [vmem:[%s1438_s23 + $0x198] sm:$0xff]  ;;  %v258_v57 = vld [vmem:[%s1438_s23 + $0x1a0] sm:$0xff]  ;;  %v227_v58 = vld [vmem:[%s1438_s23 + $0xa8] sm:$0xff] }
  0x5c   : > { %957 = vmatpush3.msra.mxu0 %v276_v9  ;;  %1091 = vmatpush3.msra.mxu1 %v276_v9  ;;  %v259_v59 = vld [vmem:[%s1438_s23 + $0x1a8] sm:$0xff]  ;;  %v228_v60 = vld [vmem:[%s1438_s23 + $0xb0] sm:$0xff]  ;;  %v229_v62 = vld [vmem:[%s1438_s23 + $0xb8] sm:$0xff] }
  0x5d   : > { %958 = vmatprep.subr.mxu0 %v275_v10  ;;  %1076 = vmatprep.subr.mxu1 %v275_v10  ;;  %v260_v61 = vld [vmem:[%s1438_s23 + $0x1b0] sm:$0xff]  ;;  %v261_v63 = vld [vmem:[%s1438_s23 + $0x1b8] sm:$0xff]  ;;  %v230_v0 = vld [vmem:[%s1438_s23 + $0xc0] sm:$0xff] }
  0x5e   : > { %959 = vmatpush3.msra.mxu0 %v275_v10  ;;  %1092 = vmatpush3.msra.mxu1 %v275_v10  ;;  %v262_v1 = vld [vmem:[%s1438_s23 + $0x1c0] sm:$0xff]  ;;  %v231_v2 = vld [vmem:[%s1438_s23 + $0xc8] sm:$0xff]  ;;  %v232_v4 = vld [vmem:[%s1438_s23 + $0xd0] sm:$0xff] }
  0x5f   : > { %960 = vmatprep.subr.mxu0 %v274_v11  ;;  %1077 = vmatprep.subr.mxu1 %v274_v11  ;;  %v263_v3 = vld [vmem:[%s1438_s23 + $0x1c8] sm:$0xff]  ;;  %v264_v5 = vld [vmem:[%s1438_s23 + $0x1d0] sm:$0xff]  ;;  %v233_v6 = vld [vmem:[%s1438_s23 + $0xd8] sm:$0xff] }
  0x60   : > { %961 = vmatpush3.msra.mxu0 %v274_v11  ;;  %1093 = vmatpush3.msra.mxu1 %v274_v11  ;;  %v265_v7 = vld [vmem:[%s1438_s23 + $0x1d8] sm:$0xff]  ;;  %v234_v8 = vld [vmem:[%s1438_s23 + $0xe0] sm:$0xff]  ;;  %v235_v10 = vld [vmem:[%s1438_s23 + $0xe8] sm:$0xff] }
  0x61   : > { %962 = vmatprep.subr.mxu0 %v273_v12  ;;  %1078 = vmatprep.subr.mxu1 %v273_v12  ;;  %v266_v9 = vld [vmem:[%s1438_s23 + $0x1e0] sm:$0xff]  ;;  %v267_v11 = vld [vmem:[%s1438_s23 + $0x1e8] sm:$0xff] }
  0x62   : > { %963 = vmatpush3.msra.mxu0 %v273_v12  ;;  %1094 = vmatpush3.msra.mxu1 %v273_v12  ;;  %v236_v12 = vld [vmem:[%s1438_s23 + $0xf0] sm:$0xff] }
  0x63   : > { %964 = vmatprep.subr.mxu0 %v272_v13  ;;  %1079 = vmatprep.subr.mxu1 %v272_v13 }
  0x64   : > { %965 = vmatpush3.msra.mxu0 %v272_v13  ;;  %1095 = vmatpush3.msra.mxu1 %v272_v13  ;;  %v268_v13 = vld [vmem:[%s1438_s23 + $0x1f0] sm:$0xff] }
  0x65   : > { %966 = vmatprep.subr.mxu0 %v271_v14  ;;  %1080 = vmatprep.subr.mxu1 %v271_v14 }
  0x66   : > { %967 = vmatpush3.msra.mxu0 %v271_v14  ;;  %1096 = vmatpush3.msra.mxu1 %v271_v14  ;;  %v237_v14 = vld [vmem:[%s1438_s23 + $0xf8] sm:$0xff] }
  0x67   : > { %968 = vmatprep.subr.mxu0 %v270_v15  ;;  %1081 = vmatprep.subr.mxu1 %v270_v15 }
  0x68   : > { %969 = vmatpush3.msra.mxu0 %v270_v15  ;;  %1097 = vmatpush3.msra.mxu1 %v270_v15  ;;  %v269_v15 = vld [vmem:[%s1438_s23 + $0x1f8] sm:$0xff] }
  0x69   : > { %970 = vmatprep.mubr.f32.mxu0 %v206_v16  ;;  %1018 = vmatprep.mubr.f32.mxu1 %v238_v17  ;;  %v1515_v16 = vld [vmem:[%s1701_s2] ss:$0 sm:$0xff] }
  0x6a   : > { %971 = vmatmul.mubr.f32.vlgmr.msra.gmra.mxu0 %v207_v18  ;;  %1019 = vmatmul.mubr.f32.vlgmr.msra.gmra.mxu1 %v239_v19 }
  0x6b   : > { %973 = vmatprep.mubr.f32.mxu0 %v208_v20  ;;  %1021 = vmatprep.mubr.f32.mxu1 %v240_v21 }
  0x6e   : > { %974 = vmatmul.mubr.f32.gmra.mxu0 %v209_v22  ;;  %1022 = vmatmul.mubr.f32.gmra.mxu1 %v241_v23 }
  0x6f   : > { %976 = vmatprep.mubr.f32.mxu0 %v210_v24  ;;  %1024 = vmatprep.mubr.f32.mxu1 %v242_v25 }
  0x72   : > { %977 = vmatmul.mubr.f32.gmra.mxu0 %v211_v26  ;;  %1025 = vmatmul.mubr.f32.gmra.mxu1 %v243_v27 }
  0x73   : > { %979 = vmatprep.mubr.f32.mxu0 %v212_v28  ;;  %1027 = vmatprep.mubr.f32.mxu1 %v244_v29 }
  0x76   : > { %980 = vmatmul.mubr.f32.gmra.mxu0 %v213_v30  ;;  %1028 = vmatmul.mubr.f32.gmra.mxu1 %v245_v31 }
  0x77   : > { %982 = vmatprep.mubr.f32.mxu0 %v214_v32  ;;  %1030 = vmatprep.mubr.f32.mxu1 %v246_v33 }
  0x7a   : > { %983 = vmatmul.mubr.f32.gmra.mxu0 %v215_v34  ;;  %1031 = vmatmul.mubr.f32.gmra.mxu1 %v247_v35 }
  0x7b   : > { %985 = vmatprep.mubr.f32.mxu0 %v216_v36  ;;  %1033 = vmatprep.mubr.f32.mxu1 %v248_v37 }
  0x7e   : > { %986 = vmatmul.mubr.f32.gmra.mxu0 %v217_v38  ;;  %1034 = vmatmul.mubr.f32.gmra.mxu1 %v249_v39 }
  0x7f   : > { %988 = vmatprep.mubr.f32.mxu0 %v218_v40  ;;  %1036 = vmatprep.mubr.f32.mxu1 %v250_v41 }
  0x82   : > { %989 = vmatmul.mubr.f32.gmra.mxu0 %v219_v42  ;;  %1037 = vmatmul.mubr.f32.gmra.mxu1 %v251_v43 }
  0x83   : > { %991 = vmatprep.mubr.f32.mxu0 %v220_v44  ;;  %1039 = vmatprep.mubr.f32.mxu1 %v252_v45 }
  0x86   : > { %992 = vmatmul.mubr.f32.gmra.mxu0 %v221_v46  ;;  %1040 = vmatmul.mubr.f32.gmra.mxu1 %v253_v47 }
  0x87   : > { %994 = vmatprep.mubr.f32.mxu0 %v222_v48  ;;  %1042 = vmatprep.mubr.f32.mxu1 %v254_v49 }
  0x8a   : > { %995 = vmatmul.mubr.f32.gmra.mxu0 %v223_v50  ;;  %1043 = vmatmul.mubr.f32.gmra.mxu1 %v255_v51 }
  0x8b   : > { %997 = vmatprep.mubr.f32.mxu0 %v224_v52  ;;  %1045 = vmatprep.mubr.f32.mxu1 %v256_v53 }
  0x8e   : > { %998 = vmatmul.mubr.f32.gmra.mxu0 %v225_v54  ;;  %1046 = vmatmul.mubr.f32.gmra.mxu1 %v257_v55 }
  0x8f   : > { %1000 = vmatprep.mubr.f32.mxu0 %v226_v56  ;;  %1048 = vmatprep.mubr.f32.mxu1 %v258_v57 }
  0x92   : > { %1001 = vmatmul.mubr.f32.gmra.mxu0 %v227_v58  ;;  %1049 = vmatmul.mubr.f32.gmra.mxu1 %v259_v59 }
  0x93   : > { %1003 = vmatprep.mubr.f32.mxu0 %v228_v60  ;;  %1051 = vmatprep.mubr.f32.mxu1 %v260_v61 }
  0x96   : > { %1004 = vmatmul.mubr.f32.gmra.mxu0 %v229_v62  ;;  %1052 = vmatmul.mubr.f32.gmra.mxu1 %v261_v63 }
  0x97   : > { %1006 = vmatprep.mubr.f32.mxu0 %v230_v0  ;;  %1054 = vmatprep.mubr.f32.mxu1 %v262_v1 }
  0x9a   : > { %1007 = vmatmul.mubr.f32.gmra.mxu0 %v231_v2  ;;  %1055 = vmatmul.mubr.f32.gmra.mxu1 %v263_v3 }
  0x9b   : > { %1009 = vmatprep.mubr.f32.mxu0 %v232_v4  ;;  %1057 = vmatprep.mubr.f32.mxu1 %v264_v5 }
  0x9e   : > { %1010 = vmatmul.mubr.f32.gmra.mxu0 %v233_v6  ;;  %1058 = vmatmul.mubr.f32.gmra.mxu1 %v265_v7 }
  0x9f   : > { %1012 = vmatprep.mubr.f32.mxu0 %v234_v8  ;;  %1060 = vmatprep.mubr.f32.mxu1 %v266_v9 }
  0xa2   : > { %1013 = vmatmul.mubr.f32.gmra.mxu0 %v235_v10  ;;  %1061 = vmatmul.mubr.f32.gmra.mxu1 %v267_v11 }
  0xa3   : > { %1015 = vmatprep.mubr.f32.mxu0 %v236_v12  ;;  %1063 = vmatprep.mubr.f32.mxu1 %v268_v13 }
  0xa6   : > { %1016 = vmatmul.mubr.f32.gmra.mxu0 %v237_v14  ;;  %1064 = vmatmul.mubr.f32.gmra.mxu1 %v269_v15 }
 0x12a   : > { %v972_v17 = vpop.f32.mrf.mxu0  ;;  %v1020_v18 = vpop.f32.mrf.mxu1 }
 0x12b   : > { %v365_v19 = vadd.f32 %v972_v17, %v1515_v16  ;;  %v525_v20 = vadd.f32 %v1020_v18, %v1515_v16 }
 0x12c   : > { %v359_v21 = vpop.f32.mrf.mxu0  ;;  %v519_v22 = vpop.f32.mrf.mxu1 }
 0x12d   : > { %679 = vst [vmem:[%s1521_s28 + $0x8] sm:$0xff] %v365_v19  ;;  %711 = vst [vmem:[%s1521_s28 + $0x108] sm:$0xff] %v525_v20  ;;  %v360_v23 = vadd.f32 %v1515_v16, %v359_v21  ;;  %v520_v24 = vadd.f32 %v1515_v16, %v519_v22 }
 0x12e   : > { %v975_v25 = vpop.f32.mrf.mxu0  ;;  %v1023_v26 = vpop.f32.mrf.mxu1 }
 0x12f   : > { %678 = vst [vmem:[%s1521_s28] sm:$0xff] %v360_v23  ;;  %710 = vst [vmem:[%s1521_s28 + $0x100] sm:$0xff] %v520_v24  ;;  %v375_v27 = vadd.f32 %v975_v25, %v1515_v16  ;;  %v535_v28 = vadd.f32 %v1023_v26, %v1515_v16 }
 0x130   : > { %v369_v29 = vpop.f32.mrf.mxu0  ;;  %v529_v30 = vpop.f32.mrf.mxu1 }
 0x131   : > { %681 = vst [vmem:[%s1521_s28 + $0x18] sm:$0xff] %v375_v27  ;;  %713 = vst [vmem:[%s1521_s28 + $0x118] sm:$0xff] %v535_v28  ;;  %v370_v31 = vadd.f32 %v1515_v16, %v369_v29  ;;  %v530_v32 = vadd.f32 %v1515_v16, %v529_v30 }
 0x132   : > { %v978_v33 = vpop.f32.mrf.mxu0  ;;  %v1026_v34 = vpop.f32.mrf.mxu1 }
 0x133   : > { %680 = vst [vmem:[%s1521_s28 + $0x10] sm:$0xff] %v370_v31  ;;  %712 = vst [vmem:[%s1521_s28 + $0x110] sm:$0xff] %v530_v32  ;;  %v385_v35 = vadd.f32 %v978_v33, %v1515_v16  ;;  %v545_v36 = vadd.f32 %v1026_v34, %v1515_v16 }
 0x134   : > { %v379_v37 = vpop.f32.mrf.mxu0  ;;  %v539_v38 = vpop.f32.mrf.mxu1 }
 0x135   : > { %683 = vst [vmem:[%s1521_s28 + $0x28] sm:$0xff] %v385_v35  ;;  %715 = vst [vmem:[%s1521_s28 + $0x128] sm:$0xff] %v545_v36  ;;  %v380_v39 = vadd.f32 %v1515_v16, %v379_v37  ;;  %v540_v40 = vadd.f32 %v1515_v16, %v539_v38 }
 0x136   : > { %v981_v41 = vpop.f32.mrf.mxu0  ;;  %v1029_v42 = vpop.f32.mrf.mxu1 }
 0x137   : > { %682 = vst [vmem:[%s1521_s28 + $0x20] sm:$0xff] %v380_v39  ;;  %714 = vst [vmem:[%s1521_s28 + $0x120] sm:$0xff] %v540_v40  ;;  %v395_v43 = vadd.f32 %v981_v41, %v1515_v16  ;;  %v555_v44 = vadd.f32 %v1029_v42, %v1515_v16 }
 0x138   : > { %v389_v45 = vpop.f32.mrf.mxu0  ;;  %v549_v46 = vpop.f32.mrf.mxu1 }
 0x139   : > { %685 = vst [vmem:[%s1521_s28 + $0x38] sm:$0xff] %v395_v43  ;;  %717 = vst [vmem:[%s1521_s28 + $0x138] sm:$0xff] %v555_v44  ;;  %v390_v47 = vadd.f32 %v1515_v16, %v389_v45  ;;  %v550_v48 = vadd.f32 %v1515_v16, %v549_v46 }
 0x13a   : > { %v984_v49 = vpop.f32.mrf.mxu0  ;;  %v1032_v50 = vpop.f32.mrf.mxu1 }
 0x13b   : > { %684 = vst [vmem:[%s1521_s28 + $0x30] sm:$0xff] %v390_v47  ;;  %716 = vst [vmem:[%s1521_s28 + $0x130] sm:$0xff] %v550_v48  ;;  %v405_v51 = vadd.f32 %v984_v49, %v1515_v16  ;;  %v565_v52 = vadd.f32 %v1032_v50, %v1515_v16 }
 0x13c   : > { %v399_v53 = vpop.f32.mrf.mxu0  ;;  %v559_v54 = vpop.f32.mrf.mxu1 }
 0x13d   : > { %687 = vst [vmem:[%s1521_s28 + $0x48] sm:$0xff] %v405_v51  ;;  %719 = vst [vmem:[%s1521_s28 + $0x148] sm:$0xff] %v565_v52  ;;  %v400_v55 = vadd.f32 %v1515_v16, %v399_v53  ;;  %v560_v56 = vadd.f32 %v1515_v16, %v559_v54 }
 0x13e   : > { %v987_v57 = vpop.f32.mrf.mxu0  ;;  %v1035_v58 = vpop.f32.mrf.mxu1 }
 0x13f   : > { %686 = vst [vmem:[%s1521_s28 + $0x40] sm:$0xff] %v400_v55  ;;  %718 = vst [vmem:[%s1521_s28 + $0x140] sm:$0xff] %v560_v56  ;;  %v415_v59 = vadd.f32 %v987_v57, %v1515_v16  ;;  %v575_v60 = vadd.f32 %v1035_v58, %v1515_v16 }
 0x140   : > { %v409_v61 = vpop.f32.mrf.mxu0  ;;  %v569_v62 = vpop.f32.mrf.mxu1 }
 0x141   : > { %689 = vst [vmem:[%s1521_s28 + $0x58] sm:$0xff] %v415_v59  ;;  %721 = vst [vmem:[%s1521_s28 + $0x158] sm:$0xff] %v575_v60  ;;  %v410_v63 = vadd.f32 %v1515_v16, %v409_v61  ;;  %v570_v0 = vadd.f32 %v1515_v16, %v569_v62 }
 0x142   : > { %v990_v1 = vpop.f32.mrf.mxu0  ;;  %v1038_v2 = vpop.f32.mrf.mxu1 }
 0x143   : > { %688 = vst [vmem:[%s1521_s28 + $0x50] sm:$0xff] %v410_v63  ;;  %720 = vst [vmem:[%s1521_s28 + $0x150] sm:$0xff] %v570_v0  ;;  %v425_v3 = vadd.f32 %v990_v1, %v1515_v16  ;;  %v585_v4 = vadd.f32 %v1038_v2, %v1515_v16 }
 0x144   : > { %v419_v5 = vpop.f32.mrf.mxu0  ;;  %v579_v6 = vpop.f32.mrf.mxu1 }
 0x145   : > { %691 = vst [vmem:[%s1521_s28 + $0x68] sm:$0xff] %v425_v3  ;;  %723 = vst [vmem:[%s1521_s28 + $0x168] sm:$0xff] %v585_v4  ;;  %v420_v7 = vadd.f32 %v1515_v16, %v419_v5  ;;  %v580_v8 = vadd.f32 %v1515_v16, %v579_v6 }
 0x146   : > { %v993_v9 = vpop.f32.mrf.mxu0  ;;  %v1041_v10 = vpop.f32.mrf.mxu1 }
 0x147   : > { %690 = vst [vmem:[%s1521_s28 + $0x60] sm:$0xff] %v420_v7  ;;  %722 = vst [vmem:[%s1521_s28 + $0x160] sm:$0xff] %v580_v8  ;;  %v435_v11 = vadd.f32 %v993_v9, %v1515_v16  ;;  %v595_v12 = vadd.f32 %v1041_v10, %v1515_v16 }
 0x148   : > { %v429_v13 = vpop.f32.mrf.mxu0  ;;  %v589_v14 = vpop.f32.mrf.mxu1 }
 0x149   : > { %693 = vst [vmem:[%s1521_s28 + $0x78] sm:$0xff] %v435_v11  ;;  %725 = vst [vmem:[%s1521_s28 + $0x178] sm:$0xff] %v595_v12  ;;  %v430_v15 = vadd.f32 %v1515_v16, %v429_v13  ;;  %v590_v17 = vadd.f32 %v1515_v16, %v589_v14 }
 0x14a   : > { %v996_v18 = vpop.f32.mrf.mxu0  ;;  %v1044_v19 = vpop.f32.mrf.mxu1 }
 0x14b   : > { %692 = vst [vmem:[%s1521_s28 + $0x70] sm:$0xff] %v430_v15  ;;  %724 = vst [vmem:[%s1521_s28 + $0x170] sm:$0xff] %v590_v17  ;;  %v445_v20 = vadd.f32 %v996_v18, %v1515_v16  ;;  %v605_v21 = vadd.f32 %v1044_v19, %v1515_v16 }
 0x14c   : > { %v439_v22 = vpop.f32.mrf.mxu0  ;;  %v599_v23 = vpop.f32.mrf.mxu1 }
 0x14d   : > { %695 = vst [vmem:[%s1521_s28 + $0x88] sm:$0xff] %v445_v20  ;;  %727 = vst [vmem:[%s1521_s28 + $0x188] sm:$0xff] %v605_v21  ;;  %v440_v24 = vadd.f32 %v1515_v16, %v439_v22  ;;  %v600_v25 = vadd.f32 %v1515_v16, %v599_v23 }
 0x14e   : > { %v999_v26 = vpop.f32.mrf.mxu0  ;;  %v1047_v27 = vpop.f32.mrf.mxu1 }
 0x14f   : > { %694 = vst [vmem:[%s1521_s28 + $0x80] sm:$0xff] %v440_v24  ;;  %726 = vst [vmem:[%s1521_s28 + $0x180] sm:$0xff] %v600_v25  ;;  %v455_v28 = vadd.f32 %v999_v26, %v1515_v16  ;;  %v615_v29 = vadd.f32 %v1047_v27, %v1515_v16 }
 0x150   : > { %v449_v30 = vpop.f32.mrf.mxu0  ;;  %v609_v31 = vpop.f32.mrf.mxu1 }
 0x151   : > { %697 = vst [vmem:[%s1521_s28 + $0x98] sm:$0xff] %v455_v28  ;;  %729 = vst [vmem:[%s1521_s28 + $0x198] sm:$0xff] %v615_v29  ;;  %v450_v32 = vadd.f32 %v1515_v16, %v449_v30  ;;  %v610_v33 = vadd.f32 %v1515_v16, %v609_v31 }
 0x152   : > { %v1002_v34 = vpop.f32.mrf.mxu0  ;;  %v1050_v35 = vpop.f32.mrf.mxu1 }
 0x153   : > { %696 = vst [vmem:[%s1521_s28 + $0x90] sm:$0xff] %v450_v32  ;;  %728 = vst [vmem:[%s1521_s28 + $0x190] sm:$0xff] %v610_v33  ;;  %v465_v36 = vadd.f32 %v1002_v34, %v1515_v16  ;;  %v625_v37 = vadd.f32 %v1050_v35, %v1515_v16 }
 0x154   : > { %v459_v38 = vpop.f32.mrf.mxu0  ;;  %v619_v39 = vpop.f32.mrf.mxu1 }
 0x155   : > { %699 = vst [vmem:[%s1521_s28 + $0xa8] sm:$0xff] %v465_v36  ;;  %731 = vst [vmem:[%s1521_s28 + $0x1a8] sm:$0xff] %v625_v37  ;;  %v460_v40 = vadd.f32 %v1515_v16, %v459_v38  ;;  %v620_v41 = vadd.f32 %v1515_v16, %v619_v39 }
 0x156   : > { %v1005_v42 = vpop.f32.mrf.mxu0  ;;  %v1053_v43 = vpop.f32.mrf.mxu1 }
 0x157   : > { %698 = vst [vmem:[%s1521_s28 + $0xa0] sm:$0xff] %v460_v40  ;;  %730 = vst [vmem:[%s1521_s28 + $0x1a0] sm:$0xff] %v620_v41  ;;  %v475_v44 = vadd.f32 %v1005_v42, %v1515_v16  ;;  %v635_v45 = vadd.f32 %v1053_v43, %v1515_v16 }
 0x158   : > { %v469_v46 = vpop.f32.mrf.mxu0  ;;  %v629_v47 = vpop.f32.mrf.mxu1 }
 0x159   : > { %701 = vst [vmem:[%s1521_s28 + $0xb8] sm:$0xff] %v475_v44  ;;  %733 = vst [vmem:[%s1521_s28 + $0x1b8] sm:$0xff] %v635_v45  ;;  %v470_v48 = vadd.f32 %v1515_v16, %v469_v46  ;;  %v630_v49 = vadd.f32 %v1515_v16, %v629_v47 }
 0x15a   : > { %v1008_v50 = vpop.f32.mrf.mxu0  ;;  %v1056_v51 = vpop.f32.mrf.mxu1 }
 0x15b   : > { %700 = vst [vmem:[%s1521_s28 + $0xb0] sm:$0xff] %v470_v48  ;;  %732 = vst [vmem:[%s1521_s28 + $0x1b0] sm:$0xff] %v630_v49  ;;  %v485_v52 = vadd.f32 %v1008_v50, %v1515_v16  ;;  %v645_v53 = vadd.f32 %v1056_v51, %v1515_v16 }
 0x15c   : > { %v479_v54 = vpop.f32.mrf.mxu0  ;;  %v639_v55 = vpop.f32.mrf.mxu1 }
 0x15d   : > { %703 = vst [vmem:[%s1521_s28 + $0xc8] sm:$0xff] %v485_v52  ;;  %735 = vst [vmem:[%s1521_s28 + $0x1c8] sm:$0xff] %v645_v53  ;;  %v480_v56 = vadd.f32 %v1515_v16, %v479_v54  ;;  %v640_v57 = vadd.f32 %v1515_v16, %v639_v55 }
 0x15e   : > { %v1011_v58 = vpop.f32.mrf.mxu0  ;;  %v1059_v59 = vpop.f32.mrf.mxu1 }
 0x15f   : > { %702 = vst [vmem:[%s1521_s28 + $0xc0] sm:$0xff] %v480_v56  ;;  %734 = vst [vmem:[%s1521_s28 + $0x1c0] sm:$0xff] %v640_v57  ;;  %v495_v60 = vadd.f32 %v1011_v58, %v1515_v16  ;;  %v655_v61 = vadd.f32 %v1059_v59, %v1515_v16 }
 0x160   : > { %v489_v62 = vpop.f32.mrf.mxu0  ;;  %v649_v63 = vpop.f32.mrf.mxu1 }
 0x161   : > { %705 = vst [vmem:[%s1521_s28 + $0xd8] sm:$0xff] %v495_v60  ;;  %737 = vst [vmem:[%s1521_s28 + $0x1d8] sm:$0xff] %v655_v61  ;;  %v490_v0 = vadd.f32 %v1515_v16, %v489_v62  ;;  %v650_v1 = vadd.f32 %v1515_v16, %v649_v63 }
 0x162   : > { %v1014_v2 = vpop.f32.mrf.mxu0  ;;  %v1062_v3 = vpop.f32.mrf.mxu1 }
 0x163   : > { %704 = vst [vmem:[%s1521_s28 + $0xd0] sm:$0xff] %v490_v0  ;;  %736 = vst [vmem:[%s1521_s28 + $0x1d0] sm:$0xff] %v650_v1  ;;  %v505_v4 = vadd.f32 %v1014_v2, %v1515_v16  ;;  %v665_v5 = vadd.f32 %v1062_v3, %v1515_v16 }
 0x164   : > { %v499_v6 = vpop.f32.mrf.mxu0  ;;  %v659_v7 = vpop.f32.mrf.mxu1 }
 0x165   : > { %707 = vst [vmem:[%s1521_s28 + $0xe8] sm:$0xff] %v505_v4  ;;  %739 = vst [vmem:[%s1521_s28 + $0x1e8] sm:$0xff] %v665_v5  ;;  %v500_v8 = vadd.f32 %v1515_v16, %v499_v6  ;;  %v660_v9 = vadd.f32 %v1515_v16, %v659_v7 }
 0x166   : > { %v1017_v10 = vpop.f32.mrf.mxu0  ;;  %v1065_v11 = vpop.f32.mrf.mxu1 }
 0x167   : > { %706 = vst [vmem:[%s1521_s28 + $0xe0] sm:$0xff] %v500_v8  ;;  %738 = vst [vmem:[%s1521_s28 + $0x1e0] sm:$0xff] %v660_v9  ;;  %v515_v12 = vadd.f32 %v1017_v10, %v1515_v16  ;;  %v675_v13 = vadd.f32 %v1065_v11, %v1515_v16 }
 0x168   : > { %v509_v14 = vpop.f32.mrf.mxu0  ;;  %v669_v15 = vpop.f32.mrf.mxu1 }
 0x169   : > { %709 = vst [vmem:[%s1521_s28 + $0xf8] sm:$0xff] %v515_v12  ;;  %741 = vst [vmem:[%s1521_s28 + $0x1f8] sm:$0xff] %v675_v13  ;;  %v510_v17 = vadd.f32 %v1515_v16, %v509_v14  ;;  %v670_v18 = vadd.f32 %v1515_v16, %v669_v15 }
 0x16b   : > { %708 = vst [vmem:[%s1521_s28 + $0xf0] sm:$0xff] %v510_v17  ;;  %740 = vst [vmem:[%s1521_s28 + $0x1f0] sm:$0xff] %v670_v18 }
 0x16c   : > { %1226 = shalt.err (!%p1223_p0)
}
 0x16d   : > { %s1227_s11 = scalar_lea.hbm %s1648_s4, 8192  ;;  %s1231_s30 = scalar_lea.hbm %s1702_s3, 16384 }
 0x16e   : > { %p1228_p5 = scmp.ne.s32.totalorder %s1648_s4, %s1227_s11  ;;  %p1232_p4 = scmp.lt.s32.totalorder %s1648_s4, %s1702_s3 }
 0x16f   : > { %p1233_p6 = scmp.lt.s32.totalorder %s1231_s30, %s1227_s11 }
 0x170   : > { %p1229_p2 = pnand %p1228_p5, %p1718_p11 }
 0x171   : > { %p1234_p8 = por %p1233_p6, %p1232_p4 }
 0x172   : > { %p1230_p1 = pneg %p1229_p2 }
 0x174   : > { %p1235_p3 = pnand %p1234_p8, %p1230_p1 }
 0x176   : > { %1238 = shalt.err (!%p1235_p3)
}
 0x177   : > { %s1288_s20 = smov 128   ;;  %s1289_s28 = smov 8  }
 0x178   : > { %1104 = dma.vmem_to_hbm [thread:$0]  (%p1718_p11), %s1650_s17, 8192, %s1648_s4, %s743_s16, %s1288_s20, %s1288_s20, %s1289_s28  }
 0x179 PF: > { %s771_s29 = sand.u32 1, %s1269_s12   ;;  %p1719_p7 = scmp.ne.s32.totalorder %s1708_s19, 0 }
 0x17a   : > { %p1720_p9 = scmp.ge.s32.totalorder %s1281_s15, 2  ;;  %s772_s22 = scalar_lea.sflag [#allocation4], %s771_s29 }
 0x17c   : > { %p1115_p10 = pnand %p1720_p9, %p1719_p7 }
 0x17e   : > { %p1116_p12 = pneg %p1115_p10 }
 0x180   : > { %1264 = dma.done.wait (%p1116_p12), %s772_s22, 8192  }
 0x181   : > { %1266 = vsyncadd (%p1116_p12), %s772_s22, 4294959104  ;;  %p17_p13 = scmp.ge.s32.totalorder %s1364_s24, 4   ;;  %s1721_s12 = smov %s1273_s13 }
 0x182   : > { %s1722_s13 = smov %s1277_s14  ;;  %s1723_s14 = smov %s1384_s5 }
 0x183   : > { %s1724_s15 = smov %s1364_s24  ;;  %19 = sbr.rel (!%p17_p13) target bundleno = 6 (0x6), region = 81 }
 0x188   :  { %777 = vsyncpa [#allocation3], 1 }
 0x189   :  { %779 = vsyncpa [#allocation3 + $0x1], 1 }
 0x18a   :  { %780 = vsyncpa [#allocation6], 1 }
 0x18b   :  { %781 = vsyncpa [#allocation4], 1 }
 0x18c   :  { %783 = vsyncpa [#allocation4 + $0x1], 1 }

</bundles_post_ra>
